<compile_context>
chip_gen: v6e
topology: v6e:2x2x1
jax: 0.10.0
libtpu: 0.0.40
codegen_flags: <defaults>
</compile_context>

<pallas_src>
import math
from functools import partial

import jax
import jax.numpy as jnp
from jax.experimental import pallas as pl
from jax.experimental.pallas import tpu as pltpu

# GEMM tile caps (bf16 operands, f32 accumulator).
TM = 512        # max M tile
TN_MAX = 512    # max N tile
TK_MAX = 2304   # max K tile (512x2304 bf16 A tile = 2.25 MiB)
LANE = 128
SUBLANE = 8


def _round_up(x, m):
    return ((x + m - 1) // m) * m


def _plan_k(K):
    """Return (tk, Kp). Single k-step (tk = Kp = 8-aligned K) when K <= TK_MAX,
    otherwise split into ~TK_MAX chunks (tk multiple of 128, Kp = tk * nsteps)."""
    if K <= TK_MAX:
        Kp = _round_up(K, SUBLANE)
        return Kp, Kp
    n = -(-K // TK_MAX)
    tk = _round_up(-(-K // n), LANE)
    return tk, tk * n


def _plan_n(N):
    """Pad N to a lane-dense multiple of 128; return (tn, Np)."""
    Np = _round_up(N, LANE)
    if Np <= TN_MAX:
        return Np, Np
    for tn in (512, 384, 256, 128):
        if Np % tn == 0:
            return tn, Np
    return LANE, Np


def _plan_m(M):
    if M <= TM:
        return M, M
    return TM, _round_up(M, TM)


# ---------------------------------------------------------------------------
# Pallas kernels: tiled GEMM with fused bias (+ residual) (+ ReLU) epilogue
# ---------------------------------------------------------------------------
def _mm_kernel(a_ref, b_ref, bias_ref, o_ref, acc_ref, *, relu):
    @pl.when(pl.program_id(2) == 0)
    def _():
        acc_ref[...] = jnp.zeros_like(acc_ref)

    acc_ref[...] += jnp.dot(a_ref[...], b_ref[...],
                            preferred_element_type=jnp.float32)

    @pl.when(pl.program_id(2) == pl.num_programs(2) - 1)
    def _():
        out = acc_ref[...] + bias_ref[...]
        if relu:
            out = jnp.maximum(out, 0.0)
        o_ref[...] = out.astype(o_ref.dtype)


def _mm_res_kernel(a_ref, b_ref, bias_ref, r_ref, o_ref, acc_ref, *, relu):
    @pl.when(pl.program_id(2) == 0)
    def _():
        acc_ref[...] = jnp.zeros_like(acc_ref)

    acc_ref[...] += jnp.dot(a_ref[...], b_ref[...],
                            preferred_element_type=jnp.float32)

    @pl.when(pl.program_id(2) == pl.num_programs(2) - 1)
    def _():
        out = acc_ref[...] + bias_ref[...] + r_ref[...].astype(jnp.float32)
        if relu:
            out = jnp.maximum(out, 0.0)
        o_ref[...] = out.astype(o_ref.dtype)


def fused_matmul(a, b_p, bias_p, residual=None, *, relu, n_out,
                 out_dtype=jnp.bfloat16):
    """out = relu?( a @ b_p + bias_p (+ residual) )[:M, :n_out].

    a:      (M, Kp)  any float dtype (cast to bf16 here)
    b_p:    (Kp, Np) bf16, BN scale folded in, lane-dense padded at init time
    bias_p: (1, Np)  f32
    residual: (M, n_out) or None
    """
    M, Kp = a.shape
    Kp2, Np = b_p.shape
    assert Kp == Kp2, (Kp, Kp2)
    assert Np % LANE == 0, Np

    tm, Mp = _plan_m(M)
    nks = -(-Kp // TK_MAX)
    assert Kp % nks == 0, (Kp, nks)
    tk = Kp // nks
    tn, _ = _plan_n(Np)

    # v7x has 2 TensorCores sharded along the parallel grid axes: avoid a (1,1)
    # parallel grid when there is enough N to split.
    if Mp // tm == 1 and Np // tn == 1 and Np >= 256 and (Np // 2) % LANE == 0:
        tn = Np // 2

    a = a.astype(jnp.bfloat16)
    if Mp != M:
        a = jnp.pad(a, ((0, Mp - M), (0, 0)))

    grid = (Mp // tm, Np // tn, Kp // tk)

    in_specs = [
        pl.BlockSpec((tm, tk), lambda i, j, k: (i, k)),
        pl.BlockSpec((tk, tn), lambda i, j, k: (k, j)),
        pl.BlockSpec((1, tn), lambda i, j, k: (0, j)),
    ]
    operands = [a, b_p, bias_p]

    if residual is None:
        kernel = partial(_mm_kernel, relu=relu)
    else:
        r = residual.astype(jnp.bfloat16)
        if r.shape != (Mp, Np):
            r = jnp.pad(r, ((0, Mp - r.shape[0]), (0, Np - r.shape[1])))
        in_specs.append(pl.BlockSpec((tm, tn), lambda i, j, k: (i, j)))
        operands.append(r)
        kernel = partial(_mm_res_kernel, relu=relu)

    # VMEM budget (double-buffered inputs + double-buffered output + f32 acc),
    # kept well under v5e's 16 MiB default scoped limit target and v7x's 64 MiB
    # physical VMEM by construction of the tile caps above.
    out_bytes = jnp.dtype(out_dtype).itemsize
    vmem_need = 2 * (tm * tk * 2 + tk * tn * 2 + tn * 4
                     + (tm * tn * 2 if residual is not None else 0))
    vmem_need += 2 * tm * tn * out_bytes + tm * tn * 4
    vmem_limit = int(min(48 * 1024 * 1024, max(32 * 1024 * 1024, 2 * vmem_need)))

    bytes_accessed = (Mp * Kp * 2) * (Np // tn) + (Kp * Np * 2) * (Mp // tm)
    bytes_accessed += Np * 4 + Mp * Np * out_bytes
    if residual is not None:
        bytes_accessed += Mp * Np * 2
    cost = pl.CostEstimate(flops=2 * Mp * Kp * Np, transcendentals=0,
                           bytes_accessed=int(bytes_accessed))

    out = pl.pallas_call(
        kernel,
        out_shape=jax.ShapeDtypeStruct((Mp, Np), out_dtype),
        grid_spec=pltpu.PrefetchScalarGridSpec(
            num_scalar_prefetch=0,
            grid=grid,
            in_specs=in_specs,
            out_specs=pl.BlockSpec((tm, tn), lambda i, j, k: (i, j)),
            scratch_shapes=[pltpu.VMEM((tm, tn), jnp.float32)],
        ),
        compiler_params=pltpu.CompilerParams(
            dimension_semantics=("parallel", "parallel", "arbitrary"),
            vmem_limit_bytes=vmem_limit),
        cost_estimate=cost,
    )(*operands)

    if Mp != M or Np != n_out:
        out = out[:M, :n_out]
    return out


# ---------------------------------------------------------------------------
# Conv + folded-BN (+residual, +ReLU) -> one fused Pallas GEMM
# ---------------------------------------------------------------------------
@partial(jax.jit,
         static_argnames=("kh", "kw", "stride", "padding", "relu", "n_out"))
def conv2d_bn(x, w_p, bias_p, residual=None, *,
              kh, kw, stride, padding, relu, n_out):
    """NHWC conv with BN folded into (w_p, bias_p), via one fused Pallas GEMM.

    x: (N, H, W, Cin) bf16.  w_p: (Kp, Np) bf16 with K = kh*kw*Cin (Kp only
    differs from K by the 8-alignment of conv1).  1x1 convs need no im2col.
    """
    N, H, W, C = x.shape
    Kp = w_p.shape[0]
    K = kh * kw * C
    OH = (H + 2 * padding - kh) // stride + 1
    OW = (W + 2 * padding - kw) // stride + 1

    if kh == 1 and kw == 1 and padding == 0:
        if stride == 1:
            cols = [x]
        else:
            cols = [x[:, :stride * (OH - 1) + 1:stride,
                      :stride * (OW - 1) + 1:stride, :]]
    else:
        xp = jnp.pad(x, ((0, 0), (padding, padding), (padding, padding), (0, 0)))
        cols = []
        for i in range(kh):
            for j in range(kw):
                cols.append(xp[:, i:i + stride * (OH - 1) + 1:stride,
                               j:j + stride * (OW - 1) + 1:stride, :])
    if Kp > K:
        # only conv1 (K=147 -> 152): 5 zero channels, appended in the same concat
        cols.append(jnp.zeros((N, OH, OW, Kp - K), x.dtype))
    patches = cols[0] if len(cols) == 1 else jnp.concatenate(cols, axis=-1)
    a = patches.reshape(N * OH * OW, Kp)

    res = None if residual is None else residual.reshape(N * OH * OW, n_out)
    out = fused_matmul(a, w_p, bias_p, res, relu=relu, n_out=n_out,
                       out_dtype=jnp.bfloat16)
    return out.reshape(N, OH, OW, n_out)


@jax.jit
def maxpool_3x3_s2_p1(x):
    # glue: tiny reduction, plain JAX
    N, H, W, C = x.shape
    xp = jnp.pad(x, ((0, 0), (1, 1), (1, 1), (0, 0)),
                 constant_values=-jnp.inf)
    OH = (H + 2 - 3) // 2 + 1
    OW = (W + 2 - 3) // 2 + 1
    out = None
    for i in range(3):
        for j in range(3):
            s = xp[:, i:i + 2 * (OH - 1) + 1:2, j:j + 2 * (OW - 1) + 1:2, :]
            out = s if out is None else jnp.maximum(out, s)
    return out


@partial(jax.jit, static_argnames=("n_out",))
def avgpool_fc(x, w_p, bias_p, *, n_out):
    feats = jnp.mean(x.astype(jnp.float32), axis=(1, 2))   # adaptive avg pool
    # K=2048 <= TK_MAX, so this is a single-grid-step GEMM.
    return fused_matmul(feats, w_p, bias_p, None, relu=False, n_out=n_out,
                        out_dtype=jnp.float32)


# ---------------------------------------------------------------------------
# Deterministic parameter construction (ResNet-152 topology, blocks = [3,8,36,3]).
# BN is folded into the conv weights here (inference mode), weights are reshaped
# to (K, Cout), cast to bf16, lane-dense padded ONCE (not per forward pass).
# ---------------------------------------------------------------------------
class KeyGen:
    def __init__(self, key):
        self.key = key

    def __call__(self):
        self.key, sub = jax.random.split(self.key)
        return sub


def make_bn(kg, c):
    gamma = 1.0 + 0.05 * jax.random.normal(kg(), (c,), jnp.float32)
    beta = 0.05 * jax.random.normal(kg(), (c,), jnp.float32)
    mean = 0.05 * jax.random.normal(kg(), (c,), jnp.float32)
    var = 1.0 + 0.1 * jax.random.uniform(kg(), (c,), jnp.float32)
    scale = gamma / jnp.sqrt(var + 1e-5)
    shift = beta - mean * scale
    return scale, shift


def prep_gemm_weights(wmat, bias):
    """Pad a (K, N) f32 weight + (N,) f32 bias to tile-friendly bf16/f32 buffers.

    K is 8-aligned only (no 128/256-multiple K padding); N is padded to a
    multiple of 128 so the GEMM output is lane-dense (result sliced afterwards).
    """
    K, N = wmat.shape
    _, Kp = _plan_k(K)
    _, Np = _plan_n(N)
    w_p = jnp.pad(wmat.astype(jnp.bfloat16), ((0, Kp - K), (0, Np - N)))
    b_p = jnp.pad(bias.astype(jnp.float32).reshape(1, N), ((0, 0), (0, Np - N)))
    return w_p, b_p


def make_conv_bn(kg, kh, kw, cin, cout):
    std = 0.2 / math.sqrt(kh * kw * cin)
    w = std * jax.random.normal(kg(), (kh, kw, cin, cout), jnp.float32)
    scale, shift = make_bn(kg, cout)
    wmat = (w * scale).reshape(kh * kw * cin, cout)   # fold BN scale into weights
    w_p, b_p = prep_gemm_weights(wmat, shift)         # BN shift becomes the bias
    return {"w": w_p, "b": b_p, "kh": kh, "kw": kw, "cout": cout}


def make_bottleneck(kg, inplanes, planes, stride):
    exp = 4
    p = {
        "conv1": make_conv_bn(kg, 1, 1, inplanes, planes),
        "conv2": make_conv_bn(kg, 3, 3, planes, planes),
        "conv3": make_conv_bn(kg, 1, 1, planes, planes * exp),
        "stride": stride,
        "down": None,
    }
    if stride != 1 or inplanes != planes * exp:
        p["down"] = make_conv_bn(kg, 1, 1, inplanes, planes * exp)
    return p


def make_encoder_params(key, embedding_dim):
    kg = KeyGen(key)
    params = {"conv1": make_conv_bn(kg, 7, 7, 3, 64)}
    layers_cfg = [(64, 3, 1), (128, 8, 2), (256, 36, 2), (512, 3, 2)]  # resnet152
    inplanes, stages = 64, []
    for planes, nblocks, stride in layers_cfg:
        blocks = [make_bottleneck(kg, inplanes, planes, stride)]
        inplanes = planes * 4
        for _ in range(nblocks - 1):
            blocks.append(make_bottleneck(kg, inplanes, planes, 1))
        stages.append(blocks)
    params["stages"] = stages
    # replaced fc = nn.Linear(2048, embedding_dim); init_weights: N(0, 0.02), bias 0
    fc_w = 0.02 * jax.random.normal(kg(), (2048, embedding_dim), jnp.float32)
    fc_b = jnp.zeros((embedding_dim,), jnp.float32)
    fc_wp, fc_bp = prep_gemm_weights(fc_w, fc_b)
    params["fc"] = {"w": fc_wp, "b": fc_bp, "n": embedding_dim}
    return params


# ---------------------------------------------------------------------------
# Forward pass (== Encoder.forward: embed = self.module(images))
# ---------------------------------------------------------------------------
def apply_conv(x, p, residual=None, *, stride, padding, relu):
    return conv2d_bn(x, p["w"], p["b"], residual,
                     kh=p["kh"], kw=p["kw"], stride=stride, padding=padding,
                     relu=relu, n_out=p["cout"])


def bottleneck_forward(x, p):
    identity = x
    out = apply_conv(x, p["conv1"], stride=1, padding=0, relu=True)
    out = apply_conv(out, p["conv2"], stride=p["stride"], padding=1, relu=True)
    if p["down"] is not None:
        identity = apply_conv(x, p["down"], stride=p["stride"], padding=0,
                              relu=False)
    # final ReLU after (bn3(conv3) + identity), fused inside the Pallas kernel
    out = apply_conv(out, p["conv3"], identity, stride=1, padding=0, relu=True)
    return out


def encoder_forward(images_nchw, params):
    # PyTorch NCHW -> NHWC; activations kept in bf16 end-to-end (the Pallas GEMM
    # accumulates and applies the epilogue in f32).
    x = jnp.transpose(images_nchw, (0, 2, 3, 1)).astype(jnp.bfloat16)
    x = apply_conv(x, params["conv1"], stride=2, padding=3, relu=True)
    x = maxpool_3x3_s2_p1(x)
    for blocks in params["stages"]:
        for p in blocks:
            x = bottleneck_forward(x, p)
    fc = params["fc"]
    embed = avgpool_fc(x, fc["w"], fc["b"], n_out=fc["n"])
    return embed


if __name__ == "__main__":
    key = jax.random.PRNGKey(0)
    pkey, xkey = jax.random.split(key)

    embedding_dim = 32          # small embedding for the synthetic test
    params = make_encoder_params(pkey, embedding_dim)

    # small images, PyTorch convention NCHW: (batch=2, channels=3, 64, 64)
    images = jax.random.normal(xkey, (2, 3, 64, 64), jnp.float32)

    embed = encoder_forward(images, params)
    embed = jax.block_until_ready(embed)

    assert embed.shape == (2, embedding_dim), embed.shape
    assert bool(jnp.all(jnp.isfinite(embed)))
    print("KERNEL_OK")
</pallas_src>

<mosaic_0001>
module attributes {stable_mosaic.version = 11 : i64} {
  func.func @_mm_kernel(%arg0: i32, %arg1: i32, %arg2: i32, %arg3: memref<512x152xbf16, #tpu.memory_space<vmem>>, %arg4: memref<152x128xbf16, #tpu.memory_space<vmem>>, %arg5: memref<1x128xf32, #tpu.memory_space<vmem>>, %arg6: memref<512x128xbf16, #tpu.memory_space<vmem>>, %arg7: memref<512x128xf32, #tpu.memory_space<vmem>>) attributes {dimension_semantics = [#tpu.dimension_semantics<parallel>, #tpu.dimension_semantics<parallel>, #tpu.dimension_semantics<arbitrary>], iteration_bounds = array<i64: 4, 1, 1>, scalar_prefetch = 0 : i64, scratch_operands = 1 : i64, tpu.core_type = #tpu.core_type<tc>, window_params = [{transform_indices = @transform_0, window_bounds = array<i64: 512, 152>}, {transform_indices = @transform_1, window_bounds = array<i64: 152, 128>}, {transform_indices = @transform_2, window_bounds = array<i64: 1, 128>}, {transform_indices = @transform_3, window_bounds = array<i64: 512, 128>}]} {
    %c0_i32 = arith.constant 0 : i32
    %0 = arith.cmpi eq, %arg2, %c0_i32 : i32
    %1 = arith.extui %0 : i1 to i32
    %c0_i32_0 = arith.constant 0 : i32
    %2 = arith.cmpi ne, %1, %c0_i32_0 : i32
    scf.if %2 {
      %cst_10 = arith.constant 0.000000e+00 : f32
      %12 = vector.broadcast %cst_10 : f32 to vector<512x128xf32>
      %c0_11 = arith.constant 0 : index
      %c0_12 = arith.constant 0 : index
      %13 = vector.load %arg7[%c0_11, %c0_12] : memref<512x128xf32, #tpu.memory_space<vmem>>, vector<512x128xf32>
      tpu.vector_store %arg7[%c0_11, %c0_12], %12 {strides = array<i32>} : memref<512x128xf32, #tpu.memory_space<vmem>>, vector<512x128xf32>,
    } else {
    }
    %c0 = arith.constant 0 : index
    %c0_1 = arith.constant 0 : index
    %3 = vector.load %arg7[%c0, %c0_1] : memref<512x128xf32, #tpu.memory_space<vmem>>, vector<512x128xf32>
    %c0_2 = arith.constant 0 : index
    %c0_3 = arith.constant 0 : index
    %4 = vector.load %arg3[%c0_2, %c0_3] : memref<512x152xbf16, #tpu.memory_space<vmem>>, vector<512x152xbf16>
    %c0_4 = arith.constant 0 : index
    %c0_5 = arith.constant 0 : index
    %5 = vector.load %arg4[%c0_4, %c0_5] : memref<152x128xbf16, #tpu.memory_space<vmem>>, vector<152x128xbf16>
    %cst = arith.constant dense<0.000000e+00> : vector<512x128xf32>
    %6 = tpu.matmul %4, %5, %cst {dimension_numbers = #tpu.dot_dimension_numbers<[1], [0], [0], [1], [0, 0, 1, 1], [], []>} : vector<512x152xbf16>, vector<152x128xbf16>, vector<512x128xf32> -> vector<512x128xf32>
    %7 = arith.addf %3, %6 : vector<512x128xf32>
    %c0_6 = arith.constant 0 : index
    %c0_7 = arith.constant 0 : index
    %8 = vector.load %arg7[%c0_6, %c0_7] : memref<512x128xf32, #tpu.memory_space<vmem>>, vector<512x128xf32>
    tpu.vector_store %arg7[%c0_6, %c0_7], %7 {strides = array<i32>} : memref<512x128xf32, #tpu.memory_space<vmem>>, vector<512x128xf32>,
    %c0_i32_8 = arith.constant 0 : i32
    %9 = arith.cmpi eq, %arg2, %c0_i32_8 : i32
    %10 = arith.extui %9 : i1 to i32
    %c0_i32_9 = arith.constant 0 : i32
    %11 = arith.cmpi ne, %10, %c0_i32_9 : i32
    scf.if %11 {
      %c0_10 = arith.constant 0 : index
      %c0_11 = arith.constant 0 : index
      %12 = vector.load %arg7[%c0_10, %c0_11] : memref<512x128xf32, #tpu.memory_space<vmem>>, vector<512x128xf32>
      %c0_12 = arith.constant 0 : index
      %c0_13 = arith.constant 0 : index
      %13 = vector.load %arg5[%c0_12, %c0_13] : memref<1x128xf32, #tpu.memory_space<vmem>>, vector<1x128xf32>
      %14 = vector.broadcast %13 : vector<1x128xf32> to vector<512x128xf32>
      %15 = arith.addf %12, %14 : vector<512x128xf32>
      %cst_14 = arith.constant 0.000000e+00 : f32
      %16 = vector.broadcast %cst_14 : f32 to vector<512x128xf32>
      %17 = arith.maximumf %15, %16 : vector<512x128xf32>
      %18 = arith.truncf %17 : vector<512x128xf32> to vector<512x128xbf16>
      %c0_15 = arith.constant 0 : index
      %c0_16 = arith.constant 0 : index
      %19 = vector.load %arg6[%c0_15, %c0_16] : memref<512x128xbf16, #tpu.memory_space<vmem>>, vector<512x128xbf16>
      tpu.vector_store %arg6[%c0_15, %c0_16], %18 {strides = array<i32>} : memref<512x128xbf16, #tpu.memory_space<vmem>>, vector<512x128xbf16>,
    } else {
    }
    return
  }
  func.func @transform_0(%arg0: i32, %arg1: i32, %arg2: i32) -> (i32, i32) {
    %c0_i32 = arith.constant 0 : i32
    return %arg0, %arg2 : i32, i32
  }
  func.func @transform_1(%arg0: i32, %arg1: i32, %arg2: i32) -> (i32, i32) {
    %c0_i32 = arith.constant 0 : i32
    return %arg2, %arg1 : i32, i32
  }
  func.func @transform_2(%arg0: i32, %arg1: i32, %arg2: i32) -> (i32, i32) {
    %c0_i32 = arith.constant 0 : i32
    %c0_i32_0 = arith.constant 0 : i32
    return %c0_i32, %arg1 : i32, i32
  }
  func.func @transform_3(%arg0: i32, %arg1: i32, %arg2: i32) -> (i32, i32) {
    %c0_i32 = arith.constant 0 : i32
    return %arg0, %arg1 : i32, i32
  }
}

</mosaic_0001>

<bundles_post_ra>
// kernel: conv2d_bn.1
= control target key start
LH: loop header
LB: loop body
LE: loop exit
PB: predicated region body
PF: predicated region fallthrough
CT: control target
= control target key end

     0   :  { %8 = vsyncpa [#allocation4], 0  ;;  %s3065_s0 = inlined_call_operand.vmem [shape: bf16[2048,152], index: 0, kind: input, shape index: {}]   ;;  %s3066_s1 = inlined_call_operand.vmem [shape: bf16[152,128], index: 1, kind: input, shape index: {}]   ;;  %s3067_s2 = inlined_call_operand.vmem [shape: f32[1,128], index: 2, kind: input, shape index: {}]   ;;  %s3068_s3 = inlined_call_operand.hbm [shape: bf16[2048,128], index: 3, kind: output, shape index: {}]  }
   0x1   :  { %10 = vsyncpa [#allocation4 + $0x1], 0  ;;  %s2716_s12 = smov 0   ;;  %s2718_s13 = smov 0  }
   0x2   :  { %s2720_s14 = smov 0   ;;  %s2722_s15 = smov 0  }
   0x3   :  { %s2724_s16 = smov 0   ;;  %s2726_s17 = smov 0  }
   0x4 LB: > { %s1986_s18 = sadd.s32 4294967295, %s2690_s17   ;;  %s1987_s19 = sadd.s32 4294967294, %s2690_s17   ;;  %s2690_s17 = sphi %s2726_s17, %s16_s17   ;;  %s2686_s16 = sphi %s2724_s16, %s3075_s16   ;;  %s2682_s15 = sphi %s2722_s15, %s3074_s15   ;;  %s2678_s14 = sphi %s2720_s14, %s3073_s14   ;;  %s2674_s13 = sphi %s2718_s13, %s3072_s13   ;;  %s2670_s12 = sphi %s2716_s12, %s3071_s12  }
   0x5   : > { %s35_s20 = sadd.s32 1, %s2686_s16  ;;  %s126_s21 = sadd.s32 1, %s2678_s14 }
   0x6   : > { %p37_p0 = scmp.ge.s32.totalorder %s35_s20, 4  ;;  %p136_p1 = scmp.ne.s32.totalorder %s2678_s14, %s2674_s13 }
   0x7   : > { %p137_p2 = scmp.eq.s32.totalorder %s1986_s18, 3  ;;  %p142_p3 = scmp.ne.s32.totalorder %s2674_s13, %s2670_s12 }
   0x8   : > { %s3077_s20 = smov (%p37_p0, %s35_s20), 0  ;;  %p143_p5 = scmp.eq.s32.totalorder %s1987_s19, 3 }
   0x9   : > { %p2756_p4 = por %p137_p2, %p136_p1  ;;  %s121_s23 = ssub.s32 %s2686_s16, %s3077_s20 }
   0xa   : > { %p1992_p6 = scmp.ge.s32.totalorder %s2690_s17, 1  ;;  %p124_p7 = scmp.eq.s32.totalorder %s121_s23, 0 }
   0xb   : > { %p2763_p8 = por %p143_p5, %p142_p3  ;;  %p194_p9 = scmp.lt.s32.totalorder %s2690_s17, 5 }
   0xc   : > { %s2769_s25 = scalar_select %p124_p7, %s2678_s14, %s126_s21  }
   0xd   : > { %p195_p10 = pnand %p1992_p6, %p194_p9 }
   0xe   : > { %s1994_s30 = sshll.u32 (!%p195_p10), %s2682_s15, 6  ;;  %s231_s10 = sand.u32 (!%p195_p10), 1, %s2674_s13  }
   0xf   : > { %198 = sbr.rel (%p195_p10) target bundleno = 398 (0x18e), region = 32  ;;  %p236_p11 = scmp.lt.s32.totalorder (!%p195_p10), %s1994_s30, 255 }
  0x10   : > { %s2238_s18 = sshll.u32 (!%p195_p10), %s2682_s15, 12  ;;  %s3020_s15 = scalar_lea.sflag (!%p195_p10), [#allocation4], %s231_s10 }
  0x11   : > { %s3012_s26 = scalar_lea.hbm (!%p195_p10), %s3068_s3, %s2238_s18  ;;  %s2693_s28 = smov (!%p195_p10), [#allocation3]  }
  0x12   : > { %s2618_s29 = sshll.u32 (!%p195_p10), %s2693_s28, 4  ;;  %s2619_s29 = int_to_ptr.vmem [resolvable:$false] %s2618_s29 }
  0x14   : > { %v2508_v0 = vld [vmem:[%s3066_s1 + $0x38] sm:$0xff]   ;;  %v2692_v1 = vmov 0   ;;  %v2509_v2 = vld [vmem:[%s3066_s1 + $0x30] sm:$0xff]   ;;  %s3079_s30 = smov (!%p236_p11, %s1994_s30), 255  ;;  %v2510_v3 = vld [vmem:[%s3066_s1 + $0x28] sm:$0xff]   ;;  %vm820_vm0 = vcmask 195584  }
  0x15   : > { %921 = vmatprep.subr.bf16.mxu0 %v2692_v1  ;;  %2430 = vmatprep.subr.bf16.mxu1 %v2692_v1  ;;  %s2173_s6 = sshll.u32 %s3079_s30, 3  ;;  %v2511_v4 = vld [vmem:[%s3066_s1 + $0x20] sm:$0xff]   ;;  %v2512_v7 = vld [vmem:[%s3066_s1 + $0x18] sm:$0xff]   ;;  %v2513_v8 = vld [vmem:[%s3066_s1 + $0x10] sm:$0xff]   ;;  %vm917_vm1 = vcmask 1043456   ;;  %s2620_s30 = scalar_lea.vmem %s2619_s29, 8192 }
  0x16   : > { %922 = vmatpush1.bf16.msra.mxu0 %v2508_v0  ;;  %2440 = vmatpush1.bf16.msra.mxu1 %v2508_v0  ;;  %s2784_s9 = scalar_lea.vmem %s3065_s0, %s2173_s6  ;;  %v2514_v9 = vld [vmem:[%s3066_s1 + $0x8] sm:$0xff]   ;;  %v2515_v10 = vld [vmem:[%s3066_s1] sm:$0xff]  }
  0x17   : > { %923 = vmatprep.subr.bf16.mxu0 %v2692_v1  ;;  %2431 = vmatprep.subr.bf16.mxu1 %v2692_v1  ;;  %v2520_v5 = vld [vmem:[%s2784_s9 + $0x4] ss:$8 sps:$4 sm:$0xff]   ;;  %v2516_v11 = vld [vmem:[%s3066_s1 + $0x48] ss:$0 sps:$4 sm:$0xff]   ;;  %v2524_v16 = vld [vmem:[%s2784_s9 + $0x14] ss:$8 sps:$4 sm:$0xff]  }
  0x18   : > { %2071 = vmatprep.mubr.msk.bf16.mxu0 %vm820_vm0, %v2520_v5  ;;  %v2523_v6 = vld [vmem:[%s2784_s9 + $0x104] ss:$8 sps:$4 sm:$0xff]   ;;  %v919_v12 = vsel %vm917_vm1, %v2516_v11, 0  ;;  %v2518_v14 = vld [vmem:[%s2784_s9] ss:$8 sps:$4 sm:$0xff]  }
  0x19   : > { %2087 = vmatprep.mubr.msk.bf16.mxu1 %vm820_vm0, %v2523_v6  ;;  %v2517_v13 = vld [vmem:[%s3066_s1 + $0x40] sm:$0xff]   ;;  %v2526_v17 = vld [vmem:[%s2784_s9 + $0x114] ss:$8 sps:$4 sm:$0xff]   ;;  %v2528_v18 = vld [vmem:[%s2784_s9 + $0x10] ss:$8 sps:$4 sm:$0xff]  }
  0x1a   : > { %924 = vmatpush1.bf16.msra.mxu0 %v2509_v2  ;;  %2441 = vmatpush1.bf16.msra.mxu1 %v2509_v2  ;;  %v2521_v15 = vld [vmem:[%s2784_s9 + $0x100] ss:$8 sps:$4 sm:$0xff]   ;;  %v2529_v19 = vld [vmem:[%s2784_s9 + $0x110] ss:$8 sps:$4 sm:$0xff]   ;;  %v2530_v20 = vld [vmem:[%s2784_s9 + $0x24] ss:$8 sps:$4 sm:$0xff]  }
  0x1b   : > { %925 = vmatprep.subr.bf16.mxu0 %v2692_v1  ;;  %2432 = vmatprep.subr.bf16.mxu1 %v2692_v1  ;;  %v2532_v21 = vld [vmem:[%s2784_s9 + $0x124] ss:$8 sps:$4 sm:$0xff]   ;;  %v2534_v22 = vld [vmem:[%s2784_s9 + $0x20] ss:$8 sps:$4 sm:$0xff]   ;;  %v2536_v24 = vld [vmem:[%s2784_s9 + $0x34] ss:$8 sps:$4 sm:$0xff]  }
  0x1c   : > { %v2535_v23 = vld [vmem:[%s2784_s9 + $0x120] ss:$8 sps:$4 sm:$0xff]   ;;  %v2538_v25 = vld [vmem:[%s2784_s9 + $0x134] ss:$8 sps:$4 sm:$0xff]   ;;  %v2540_v26 = vld [vmem:[%s2784_s9 + $0x30] ss:$8 sps:$4 sm:$0xff]  }
  0x1d   : > { %v2541_v27 = vld [vmem:[%s2784_s9 + $0x130] ss:$8 sps:$4 sm:$0xff]   ;;  %v2542_v28 = vld [vmem:[%s2784_s9 + $0x44] ss:$8 sps:$4 sm:$0xff]   ;;  %v2546_v30 = vld [vmem:[%s2784_s9 + $0x40] ss:$8 sps:$4 sm:$0xff]  }
  0x1e   : > { %926 = vmatpush1.bf16.msra.mxu0 %v2510_v3  ;;  %2442 = vmatpush1.bf16.msra.mxu1 %v2510_v3  ;;  %v2544_v29 = vld [vmem:[%s2784_s9 + $0x144] ss:$8 sps:$4 sm:$0xff]   ;;  %v2547_v31 = vld [vmem:[%s2784_s9 + $0x140] ss:$8 sps:$4 sm:$0xff]   ;;  %v2548_v32 = vld [vmem:[%s2784_s9 + $0x54] ss:$8 sps:$4 sm:$0xff]  }
  0x1f   : > { %927 = vmatprep.subr.bf16.mxu0 %v2692_v1  ;;  %2433 = vmatprep.subr.bf16.mxu1 %v2692_v1  ;;  %v2550_v33 = vld [vmem:[%s2784_s9 + $0x154] ss:$8 sps:$4 sm:$0xff]   ;;  %v2552_v34 = vld [vmem:[%s2784_s9 + $0x50] ss:$8 sps:$4 sm:$0xff]   ;;  %v2554_v36 = vld [vmem:[%s2784_s9 + $0x64] ss:$8 sps:$4 sm:$0xff]  }
  0x20   : > { %v2553_v35 = vld [vmem:[%s2784_s9 + $0x150] ss:$8 sps:$4 sm:$0xff]   ;;  %v2556_v37 = vld [vmem:[%s2784_s9 + $0x164] ss:$8 sps:$4 sm:$0xff]   ;;  %v2558_v38 = vld [vmem:[%s2784_s9 + $0x60] ss:$8 sps:$4 sm:$0xff]  }
  0x21   : > { %v2559_v39 = vld [vmem:[%s2784_s9 + $0x160] ss:$8 sps:$4 sm:$0xff]   ;;  %v2560_v40 = vld [vmem:[%s2784_s9 + $0x74] ss:$8 sps:$4 sm:$0xff]   ;;  %v2564_v42 = vld [vmem:[%s2784_s9 + $0x70] ss:$8 sps:$4 sm:$0xff]  }
  0x22   : > { %928 = vmatpush1.bf16.msra.mxu0 %v2511_v4  ;;  %2443 = vmatpush1.bf16.msra.mxu1 %v2511_v4  ;;  %v2562_v41 = vld [vmem:[%s2784_s9 + $0x174] ss:$8 sps:$4 sm:$0xff]   ;;  %v2565_v43 = vld [vmem:[%s2784_s9 + $0x170] ss:$8 sps:$4 sm:$0xff]   ;;  %v2566_v44 = vld [vmem:[%s2784_s9 + $0x84] ss:$8 sps:$4 sm:$0xff]  }
  0x23   : > { %929 = vmatprep.subr.bf16.mxu0 %v2692_v1  ;;  %2434 = vmatprep.subr.bf16.mxu1 %v2692_v1  ;;  %v2568_v45 = vld [vmem:[%s2784_s9 + $0x184] ss:$8 sps:$4 sm:$0xff]   ;;  %v2570_v46 = vld [vmem:[%s2784_s9 + $0x80] ss:$8 sps:$4 sm:$0xff]   ;;  %v2572_v48 = vld [vmem:[%s2784_s9 + $0x94] ss:$8 sps:$4 sm:$0xff]  }
  0x24   : > { %v2571_v47 = vld [vmem:[%s2784_s9 + $0x180] ss:$8 sps:$4 sm:$0xff]   ;;  %v2574_v49 = vld [vmem:[%s2784_s9 + $0x194] ss:$8 sps:$4 sm:$0xff]   ;;  %v2576_v50 = vld [vmem:[%s2784_s9 + $0x90] ss:$8 sps:$4 sm:$0xff]  }
  0x25   : > { %v2577_v51 = vld [vmem:[%s2784_s9 + $0x190] ss:$8 sps:$4 sm:$0xff]   ;;  %v2578_v52 = vld [vmem:[%s2784_s9 + $0xa4] ss:$8 sps:$4 sm:$0xff]   ;;  %v2582_v54 = vld [vmem:[%s2784_s9 + $0xa0] ss:$8 sps:$4 sm:$0xff]  }
  0x26   : > { %930 = vmatpush1.bf16.msra.mxu0 %v2512_v7  ;;  %2444 = vmatpush1.bf16.msra.mxu1 %v2512_v7  ;;  %v2580_v53 = vld [vmem:[%s2784_s9 + $0x1a4] ss:$8 sps:$4 sm:$0xff]   ;;  %v2583_v55 = vld [vmem:[%s2784_s9 + $0x1a0] ss:$8 sps:$4 sm:$0xff]   ;;  %v2584_v56 = vld [vmem:[%s2784_s9 + $0xb4] ss:$8 sps:$4 sm:$0xff]  }
  0x27   : > { %931 = vmatprep.subr.bf16.mxu0 %v2692_v1  ;;  %2435 = vmatprep.subr.bf16.mxu1 %v2692_v1  ;;  %v2586_v57 = vld [vmem:[%s2784_s9 + $0x1b4] ss:$8 sps:$4 sm:$0xff]   ;;  %v2588_v58 = vld [vmem:[%s2784_s9 + $0xb0] ss:$8 sps:$4 sm:$0xff]   ;;  %v2590_v60 = vld [vmem:[%s2784_s9 + $0xc4] ss:$8 sps:$4 sm:$0xff]  }
  0x28   : > { %v2589_v59 = vld [vmem:[%s2784_s9 + $0x1b0] ss:$8 sps:$4 sm:$0xff]   ;;  %v2592_v61 = vld [vmem:[%s2784_s9 + $0x1c4] ss:$8 sps:$4 sm:$0xff]   ;;  %v2594_v62 = vld [vmem:[%s2784_s9 + $0xc0] ss:$8 sps:$4 sm:$0xff]  }
  0x29   : > { %v2595_v63 = vld [vmem:[%s2784_s9 + $0x1c0] ss:$8 sps:$4 sm:$0xff]   ;;  %v2596_v0 = vld [vmem:[%s2784_s9 + $0xd4] ss:$8 sps:$4 sm:$0xff]   ;;  %v2600_v2 = vld [vmem:[%s2784_s9 + $0xd0] ss:$8 sps:$4 sm:$0xff]  }
  0x2a   : > { %932 = vmatpush1.bf16.msra.mxu0 %v2513_v8  ;;  %2445 = vmatpush1.bf16.msra.mxu1 %v2513_v8  ;;  %v2601_v3 = vld [vmem:[%s2784_s9 + $0x1d0] ss:$8 sps:$4 sm:$0xff]   ;;  %v2602_v4 = vld [vmem:[%s2784_s9 + $0xe4] ss:$8 sps:$4 sm:$0xff]   ;;  %v2606_v6 = vld [vmem:[%s2784_s9 + $0xe0] ss:$8 sps:$4 sm:$0xff]  }
  0x2b   : > { %933 = vmatprep.subr.bf16.mxu0 %v2692_v1  ;;  %2436 = vmatprep.subr.bf16.mxu1 %v2692_v1  ;;  %v2604_v5 = vld [vmem:[%s2784_s9 + $0x1e4] ss:$8 sps:$4 sm:$0xff]   ;;  %v2607_v7 = vld [vmem:[%s2784_s9 + $0x1e0] ss:$8 sps:$4 sm:$0xff]   ;;  %v2608_v8 = vld [vmem:[%s2784_s9 + $0xf4] ss:$8 sps:$4 sm:$0xff]  }
  0x2c   : > { %v2613_v11 = vld [vmem:[%s2784_s9 + $0x1f0] ss:$8 sps:$4 sm:$0xff]  }
  0x2e   : > { %934 = vmatpush1.bf16.msra.mxu0 %v2514_v9  ;;  %2446 = vmatpush1.bf16.msra.mxu1 %v2514_v9  ;;  %v2610_v9 = vld [vmem:[%s2784_s9 + $0x1f4] ss:$8 sps:$4 sm:$0xff]  }
  0x2f   : > { %935 = vmatprep.subr.bf16.mxu0 %v2692_v1  ;;  %2437 = vmatprep.subr.bf16.mxu1 %v2692_v1 }
  0x32   : > { %936 = vmatpush1.bf16.msra.mxu0 %v2515_v10  ;;  %2447 = vmatpush1.bf16.msra.mxu1 %v2515_v10  ;;  %v2612_v10 = vld [vmem:[%s2784_s9 + $0xf0] ss:$8 sps:$4 sm:$0xff]  }
  0x33   : > { %949 = vmatprep.subr.bf16.mxu0 %v2692_v1  ;;  %2438 = vmatprep.subr.bf16.mxu1 %v2692_v1 }
  0x36   : > { %950 = vmatpush2.bf16.msra.mxu0 %v919_v12  ;;  %2448 = vmatpush2.bf16.msra.mxu1 %v919_v12 }
  0x37   : > { %951 = vmatprep.subr.bf16.mxu0 %v2692_v1  ;;  %2439 = vmatprep.subr.bf16.mxu1 %v2692_v1  ;;  %v2598_v1 = vld [vmem:[%s2784_s9 + $0x1d4] ss:$8 sps:$4 sm:$0xff]   ;;  %s1993_s9 = sshll.u32 %s231_s10, 8 }
  0x38   : > { %s2915_s11 = scalar_lea.vmem [#allocation3], %s1993_s9 }
  0x39   : > { %s1875_s19 = sshll.u32 %s2915_s11, 4  ;;  %s3014_s19 = int_to_ptr.vmem [resolvable:$true] %s1875_s19 }
  0x3a   : > { %952 = vmatpush2.bf16.msra.mxu0 %v2517_v13  ;;  %2449 = vmatpush2.bf16.msra.mxu1 %v2517_v13  ;;  %v2906_v13 = vld [vmem:[%s3067_s2] ss:$0 sm:$0xff]  ;;  %s2614_s27 = scalar_lea.vmem %s3014_s19, 4096  ;;  %p2621_p1 = scmp.lt.s32.totalorder %s3014_s19, %s2619_s29 }
  0x3b   : > { %p2615_p12 = scmp.ne.s32.totalorder %s3014_s19, %s2614_s27  ;;  %p2622_p2 = scmp.lt.s32.totalorder %s2620_s30, %s2614_s27 }
  0x3d   : > { %954 = vmatmul.mubr.bf16.vlgmr.msra.gmra.mxu0 %v2518_v14  ;;  %1082 = vmatmul.mubr.bf16.vlgmr.msra.gmra.mxu1 %v2521_v15  ;;  %p2616_p13 = pnand %p2615_p12, %p2756_p4  ;;  %p2623_p3 = por %p2622_p2, %p2621_p1 }
  0x3e   : > { %2072 = vmatprep.mubr.msk.bf16.mxu0 %vm820_vm0, %v2524_v16  ;;  %2088 = vmatprep.mubr.msk.bf16.mxu1 %vm820_vm0, %v2526_v17 }
  0x3f   : > { %p2617_p0 = pneg %p2616_p13 }
  0x41   : > { %p2624_p5 = pnand %p2623_p3, %p2617_p0 }
  0x45   : > { %962 = vmatmul.mubr.bf16.gmra.mxu0 %v2528_v18  ;;  %1090 = vmatmul.mubr.bf16.gmra.mxu1 %v2529_v19 }
  0x46   : > { %2073 = vmatprep.mubr.msk.bf16.mxu0 %vm820_vm0, %v2530_v20  ;;  %2089 = vmatprep.mubr.msk.bf16.mxu1 %vm820_vm0, %v2532_v21 }
  0x4d   : > { %970 = vmatmul.mubr.bf16.gmra.mxu0 %v2534_v22  ;;  %1098 = vmatmul.mubr.bf16.gmra.mxu1 %v2535_v23 }
  0x4e   : > { %2074 = vmatprep.mubr.msk.bf16.mxu0 %vm820_vm0, %v2536_v24  ;;  %2090 = vmatprep.mubr.msk.bf16.mxu1 %vm820_vm0, %v2538_v25 }
  0x55   : > { %978 = vmatmul.mubr.bf16.gmra.mxu0 %v2540_v26  ;;  %1106 = vmatmul.mubr.bf16.gmra.mxu1 %v2541_v27 }
  0x56   : > { %2075 = vmatprep.mubr.msk.bf16.mxu0 %vm820_vm0, %v2542_v28  ;;  %2091 = vmatprep.mubr.msk.bf16.mxu1 %vm820_vm0, %v2544_v29 }
  0x5d   : > { %986 = vmatmul.mubr.bf16.gmra.mxu0 %v2546_v30  ;;  %1114 = vmatmul.mubr.bf16.gmra.mxu1 %v2547_v31 }
  0x5e   : > { %2076 = vmatprep.mubr.msk.bf16.mxu0 %vm820_vm0, %v2548_v32  ;;  %2092 = vmatprep.mubr.msk.bf16.mxu1 %vm820_vm0, %v2550_v33 }
  0x65   : > { %994 = vmatmul.mubr.bf16.gmra.mxu0 %v2552_v34  ;;  %1122 = vmatmul.mubr.bf16.gmra.mxu1 %v2553_v35 }
  0x66   : > { %2077 = vmatprep.mubr.msk.bf16.mxu0 %vm820_vm0, %v2554_v36  ;;  %2093 = vmatprep.mubr.msk.bf16.mxu1 %vm820_vm0, %v2556_v37 }
  0x6d   : > { %1002 = vmatmul.mubr.bf16.gmra.mxu0 %v2558_v38  ;;  %1130 = vmatmul.mubr.bf16.gmra.mxu1 %v2559_v39 }
  0x6e   : > { %2078 = vmatprep.mubr.msk.bf16.mxu0 %vm820_vm0, %v2560_v40  ;;  %2094 = vmatprep.mubr.msk.bf16.mxu1 %vm820_vm0, %v2562_v41 }
  0x75   : > { %1010 = vmatmul.mubr.bf16.gmra.mxu0 %v2564_v42  ;;  %1138 = vmatmul.mubr.bf16.gmra.mxu1 %v2565_v43 }
  0x76   : > { %2079 = vmatprep.mubr.msk.bf16.mxu0 %vm820_vm0, %v2566_v44  ;;  %2095 = vmatprep.mubr.msk.bf16.mxu1 %vm820_vm0, %v2568_v45 }
  0x7d   : > { %1018 = vmatmul.mubr.bf16.gmra.mxu0 %v2570_v46  ;;  %1146 = vmatmul.mubr.bf16.gmra.mxu1 %v2571_v47 }
  0x7e   : > { %2080 = vmatprep.mubr.msk.bf16.mxu0 %vm820_vm0, %v2572_v48  ;;  %2096 = vmatprep.mubr.msk.bf16.mxu1 %vm820_vm0, %v2574_v49 }
  0x85   : > { %1026 = vmatmul.mubr.bf16.gmra.mxu0 %v2576_v50  ;;  %1154 = vmatmul.mubr.bf16.gmra.mxu1 %v2577_v51 }
  0x86   : > { %2081 = vmatprep.mubr.msk.bf16.mxu0 %vm820_vm0, %v2578_v52  ;;  %2097 = vmatprep.mubr.msk.bf16.mxu1 %vm820_vm0, %v2580_v53 }
  0x8d   : > { %1034 = vmatmul.mubr.bf16.gmra.mxu0 %v2582_v54  ;;  %1162 = vmatmul.mubr.bf16.gmra.mxu1 %v2583_v55 }
  0x8e   : > { %2082 = vmatprep.mubr.msk.bf16.mxu0 %vm820_vm0, %v2584_v56  ;;  %2098 = vmatprep.mubr.msk.bf16.mxu1 %vm820_vm0, %v2586_v57 }
  0x95   : > { %1042 = vmatmul.mubr.bf16.gmra.mxu0 %v2588_v58  ;;  %1170 = vmatmul.mubr.bf16.gmra.mxu1 %v2589_v59 }
  0x96   : > { %2083 = vmatprep.mubr.msk.bf16.mxu0 %vm820_vm0, %v2590_v60  ;;  %2099 = vmatprep.mubr.msk.bf16.mxu1 %vm820_vm0, %v2592_v61 }
  0x9d   : > { %1050 = vmatmul.mubr.bf16.gmra.mxu0 %v2594_v62  ;;  %1178 = vmatmul.mubr.bf16.gmra.mxu1 %v2595_v63 }
  0x9e   : > { %2084 = vmatprep.mubr.msk.bf16.mxu0 %vm820_vm0, %v2596_v0  ;;  %2100 = vmatprep.mubr.msk.bf16.mxu1 %vm820_vm0, %v2598_v1 }
  0xa5   : > { %1058 = vmatmul.mubr.bf16.gmra.mxu0 %v2600_v2  ;;  %1186 = vmatmul.mubr.bf16.gmra.mxu1 %v2601_v3 }
  0xa6   : > { %2085 = vmatprep.mubr.msk.bf16.mxu0 %vm820_vm0, %v2602_v4  ;;  %2101 = vmatprep.mubr.msk.bf16.mxu1 %vm820_vm0, %v2604_v5 }
  0xad   : > { %1066 = vmatmul.mubr.bf16.gmra.mxu0 %v2606_v6  ;;  %1194 = vmatmul.mubr.bf16.gmra.mxu1 %v2607_v7 }
  0xae   : > { %2086 = vmatprep.mubr.msk.bf16.mxu0 %vm820_vm0, %v2608_v8  ;;  %2102 = vmatprep.mubr.msk.bf16.mxu1 %vm820_vm0, %v2610_v9 }
  0xb5   : > { %1074 = vmatmul.mubr.bf16.gmra.mxu0 %v2612_v10  ;;  %1202 = vmatmul.mubr.bf16.gmra.mxu1 %v2613_v11 }
  0xfd   : > { %v955_v12 = vpop.f32.mrf.mxu0  ;;  %v1083_v14 = vpop.f32.mrf.mxu1 }
  0xfe   : > { %v1412_v17 = vadd.f32 %v2906_v13, %v955_v12  ;;  %v1444_v18 = vadd.f32 %v2906_v13, %v1083_v14 }
  0xff   : > { %v957_v15 = vpop.f32.mrf.mxu0  ;;  %v1085_v16 = vpop.f32.mrf.mxu1 }
 0x100   : > { %v1476_v25 = vmax.f32 %v1412_v17, 0.0  ;;  %v1508_v26 = vmax.f32 %v1444_v18, 0.0 }
 0x101   : > { %v958_v19 = vpop.f32.mrf.mxu0  ;;  %v1086_v20 = vpop.f32.mrf.mxu1 }
 0x102   : > { %v1413_v21 = vadd.f32 %v2906_v13, %v958_v19  ;;  %v1445_v22 = vadd.f32 %v2906_v13, %v1086_v20 }
 0x103   : > { %v960_v23 = vpop.f32.mrf.mxu0  ;;  %v1088_v24 = vpop.f32.mrf.mxu1 }
 0x104   : > { %v1477_v27 = vmax.f32 %v1413_v21, 0.0  ;;  %v1509_v28 = vmax.f32 %v1445_v22, 0.0 }
 0x105   : > { %v963_v29 = vpop.f32.mrf.mxu0  ;;  %v1091_v30 = vpop.f32.mrf.mxu1 }
 0x106   : > { %v2242_v31 = vpack.c.bf16 %v1477_v27, %v1476_v25  ;;  %v2322_v32 = vpack.c.bf16 %v1509_v28, %v1508_v26  ;;  %v1414_v35 = vadd.f32 %v2906_v13, %v963_v29  ;;  %v1446_v36 = vadd.f32 %v2906_v13, %v1091_v30 }
 0x107   : > { %v965_v33 = vpop.f32.mrf.mxu0  ;;  %v1093_v34 = vpop.f32.mrf.mxu1 }
 0x108   : > { %2243 = vst [vmem:[%s2915_s11] sm:$0xff] %v2242_v31   ;;  %2414 = vst [vmem:[%s2915_s11 + $0x80] sm:$0xff] %v2322_v32   ;;  %v1478_v43 = vmax.f32 %v1414_v35, 0.0  ;;  %v1510_v44 = vmax.f32 %v1446_v36, 0.0 }
 0x109   : > { %v966_v37 = vpop.f32.mrf.mxu0  ;;  %v1094_v38 = vpop.f32.mrf.mxu1 }
 0x10a   : > { %v1415_v39 = vadd.f32 %v2906_v13, %v966_v37  ;;  %v1447_v40 = vadd.f32 %v2906_v13, %v1094_v38 }
 0x10b   : > { %v968_v41 = vpop.f32.mrf.mxu0  ;;  %v1096_v42 = vpop.f32.mrf.mxu1 }
 0x10c   : > { %v1479_v45 = vmax.f32 %v1415_v39, 0.0  ;;  %v1511_v46 = vmax.f32 %v1447_v40, 0.0 }
 0x10d   : > { %v971_v47 = vpop.f32.mrf.mxu0  ;;  %v1099_v48 = vpop.f32.mrf.mxu1 }
 0x10e   : > { %v2247_v49 = vpack.c.bf16 %v1479_v45, %v1478_v43  ;;  %v2327_v50 = vpack.c.bf16 %v1511_v46, %v1510_v44  ;;  %v1416_v53 = vadd.f32 %v2906_v13, %v971_v47  ;;  %v1448_v54 = vadd.f32 %v2906_v13, %v1099_v48 }
 0x10f   : > { %v973_v51 = vpop.f32.mrf.mxu0  ;;  %v1101_v52 = vpop.f32.mrf.mxu1 }
 0x110   : > { %2399 = vst [vmem:[%s2915_s11 + $0x8] sm:$0xff] %v2247_v49   ;;  %2415 = vst [vmem:[%s2915_s11 + $0x88] sm:$0xff] %v2327_v50   ;;  %v1480_v61 = vmax.f32 %v1416_v53, 0.0  ;;  %v1512_v62 = vmax.f32 %v1448_v54, 0.0 }
 0x111   : > { %v974_v55 = vpop.f32.mrf.mxu0  ;;  %v1102_v56 = vpop.f32.mrf.mxu1 }
 0x112   : > { %v1417_v57 = vadd.f32 %v2906_v13, %v974_v55  ;;  %v1449_v58 = vadd.f32 %v2906_v13, %v1102_v56 }
 0x113   : > { %v976_v59 = vpop.f32.mrf.mxu0  ;;  %v1104_v60 = vpop.f32.mrf.mxu1 }
 0x114   : > { %v1481_v63 = vmax.f32 %v1417_v57, 0.0  ;;  %v1513_v0 = vmax.f32 %v1449_v58, 0.0 }
 0x115   : > { %v979_v1 = vpop.f32.mrf.mxu0  ;;  %v1107_v2 = vpop.f32.mrf.mxu1 }
 0x116   : > { %v2252_v3 = vpack.c.bf16 %v1481_v63, %v1480_v61  ;;  %v2332_v4 = vpack.c.bf16 %v1513_v0, %v1512_v62  ;;  %v1418_v7 = vadd.f32 %v2906_v13, %v979_v1  ;;  %v1450_v8 = vadd.f32 %v2906_v13, %v1107_v2 }
 0x117   : > { %v981_v5 = vpop.f32.mrf.mxu0  ;;  %v1109_v6 = vpop.f32.mrf.mxu1 }
 0x118   : > { %2400 = vst [vmem:[%s2915_s11 + $0x10] sm:$0xff] %v2252_v3   ;;  %2416 = vst [vmem:[%s2915_s11 + $0x90] sm:$0xff] %v2332_v4   ;;  %v1482_v16 = vmax.f32 %v1418_v7, 0.0  ;;  %v1514_v17 = vmax.f32 %v1450_v8, 0.0 }
 0x119   : > { %v982_v9 = vpop.f32.mrf.mxu0  ;;  %v1110_v10 = vpop.f32.mrf.mxu1 }
 0x11a   : > { %v1419_v11 = vadd.f32 %v2906_v13, %v982_v9  ;;  %v1451_v12 = vadd.f32 %v2906_v13, %v1110_v10 }
 0x11b   : > { %v984_v14 = vpop.f32.mrf.mxu0  ;;  %v1112_v15 = vpop.f32.mrf.mxu1 }
 0x11c   : > { %v1483_v18 = vmax.f32 %v1419_v11, 0.0  ;;  %v1515_v19 = vmax.f32 %v1451_v12, 0.0 }
 0x11d   : > { %v987_v20 = vpop.f32.mrf.mxu0  ;;  %v1115_v21 = vpop.f32.mrf.mxu1 }
 0x11e   : > { %v2257_v22 = vpack.c.bf16 %v1483_v18, %v1482_v16  ;;  %v2337_v23 = vpack.c.bf16 %v1515_v19, %v1514_v17  ;;  %v1420_v26 = vadd.f32 %v2906_v13, %v987_v20  ;;  %v1452_v27 = vadd.f32 %v2906_v13, %v1115_v21 }
 0x11f   : > { %v989_v24 = vpop.f32.mrf.mxu0  ;;  %v1117_v25 = vpop.f32.mrf.mxu1 }
 0x120   : > { %2401 = vst [vmem:[%s2915_s11 + $0x18] sm:$0xff] %v2257_v22   ;;  %2417 = vst [vmem:[%s2915_s11 + $0x98] sm:$0xff] %v2337_v23   ;;  %v1484_v34 = vmax.f32 %v1420_v26, 0.0  ;;  %v1516_v35 = vmax.f32 %v1452_v27, 0.0 }
 0x121   : > { %v990_v28 = vpop.f32.mrf.mxu0  ;;  %v1118_v29 = vpop.f32.mrf.mxu1 }
 0x122   : > { %v1421_v30 = vadd.f32 %v2906_v13, %v990_v28  ;;  %v1453_v31 = vadd.f32 %v2906_v13, %v1118_v29 }
 0x123   : > { %v992_v32 = vpop.f32.mrf.mxu0  ;;  %v1120_v33 = vpop.f32.mrf.mxu1 }
 0x124   : > { %v1485_v36 = vmax.f32 %v1421_v30, 0.0  ;;  %v1517_v37 = vmax.f32 %v1453_v31, 0.0 }
 0x125   : > { %v995_v38 = vpop.f32.mrf.mxu0  ;;  %v1123_v39 = vpop.f32.mrf.mxu1 }
 0x126   : > { %v2262_v40 = vpack.c.bf16 %v1485_v36, %v1484_v34  ;;  %v2342_v41 = vpack.c.bf16 %v1517_v37, %v1516_v35  ;;  %v1422_v44 = vadd.f32 %v2906_v13, %v995_v38  ;;  %v1454_v45 = vadd.f32 %v2906_v13, %v1123_v39 }
 0x127   : > { %v997_v42 = vpop.f32.mrf.mxu0  ;;  %v1125_v43 = vpop.f32.mrf.mxu1 }
 0x128   : > { %2402 = vst [vmem:[%s2915_s11 + $0x20] sm:$0xff] %v2262_v40   ;;  %2418 = vst [vmem:[%s2915_s11 + $0xa0] sm:$0xff] %v2342_v41   ;;  %v1486_v52 = vmax.f32 %v1422_v44, 0.0  ;;  %v1518_v53 = vmax.f32 %v1454_v45, 0.0 }
 0x129   : > { %v998_v46 = vpop.f32.mrf.mxu0  ;;  %v1126_v47 = vpop.f32.mrf.mxu1 }
 0x12a   : > { %v1423_v48 = vadd.f32 %v2906_v13, %v998_v46  ;;  %v1455_v49 = vadd.f32 %v2906_v13, %v1126_v47 }
 0x12b   : > { %v1000_v50 = vpop.f32.mrf.mxu0  ;;  %v1128_v51 = vpop.f32.mrf.mxu1 }
 0x12c   : > { %v1487_v54 = vmax.f32 %v1423_v48, 0.0  ;;  %v1519_v55 = vmax.f32 %v1455_v49, 0.0 }
 0x12d   : > { %v1003_v56 = vpop.f32.mrf.mxu0  ;;  %v1131_v57 = vpop.f32.mrf.mxu1 }
 0x12e   : > { %v2267_v58 = vpack.c.bf16 %v1487_v54, %v1486_v52  ;;  %v2347_v59 = vpack.c.bf16 %v1519_v55, %v1518_v53  ;;  %v1424_v62 = vadd.f32 %v2906_v13, %v1003_v56  ;;  %v1456_v63 = vadd.f32 %v2906_v13, %v1131_v57 }
 0x12f   : > { %v1005_v60 = vpop.f32.mrf.mxu0  ;;  %v1133_v61 = vpop.f32.mrf.mxu1 }
 0x130   : > { %2403 = vst [vmem:[%s2915_s11 + $0x28] sm:$0xff] %v2267_v58   ;;  %2419 = vst [vmem:[%s2915_s11 + $0xa8] sm:$0xff] %v2347_v59   ;;  %v1488_v6 = vmax.f32 %v1424_v62, 0.0  ;;  %v1520_v7 = vmax.f32 %v1456_v63, 0.0 }
 0x131   : > { %v1006_v0 = vpop.f32.mrf.mxu0  ;;  %v1134_v1 = vpop.f32.mrf.mxu1 }
 0x132   : > { %v1425_v2 = vadd.f32 %v2906_v13, %v1006_v0  ;;  %v1457_v3 = vadd.f32 %v2906_v13, %v1134_v1 }
 0x133   : > { %v1008_v4 = vpop.f32.mrf.mxu0  ;;  %v1136_v5 = vpop.f32.mrf.mxu1 }
 0x134   : > { %v1489_v8 = vmax.f32 %v1425_v2, 0.0  ;;  %v1521_v9 = vmax.f32 %v1457_v3, 0.0 }
 0x135   : > { %v1011_v10 = vpop.f32.mrf.mxu0  ;;  %v1139_v11 = vpop.f32.mrf.mxu1 }
 0x136   : > { %v2272_v12 = vpack.c.bf16 %v1489_v8, %v1488_v6  ;;  %v2352_v14 = vpack.c.bf16 %v1521_v9, %v1520_v7  ;;  %v1426_v17 = vadd.f32 %v2906_v13, %v1011_v10  ;;  %v1458_v18 = vadd.f32 %v2906_v13, %v1139_v11 }
 0x137   : > { %v1013_v15 = vpop.f32.mrf.mxu0  ;;  %v1141_v16 = vpop.f32.mrf.mxu1 }
 0x138   : > { %2404 = vst [vmem:[%s2915_s11 + $0x30] sm:$0xff] %v2272_v12   ;;  %2420 = vst [vmem:[%s2915_s11 + $0xb0] sm:$0xff] %v2352_v14   ;;  %v1490_v25 = vmax.f32 %v1426_v17, 0.0  ;;  %v1522_v26 = vmax.f32 %v1458_v18, 0.0 }
 0x139   : > { %v1014_v19 = vpop.f32.mrf.mxu0  ;;  %v1142_v20 = vpop.f32.mrf.mxu1 }
 0x13a   : > { %v1427_v21 = vadd.f32 %v2906_v13, %v1014_v19  ;;  %v1459_v22 = vadd.f32 %v2906_v13, %v1142_v20 }
 0x13b   : > { %v1016_v23 = vpop.f32.mrf.mxu0  ;;  %v1144_v24 = vpop.f32.mrf.mxu1 }
 0x13c   : > { %v1491_v27 = vmax.f32 %v1427_v21, 0.0  ;;  %v1523_v28 = vmax.f32 %v1459_v22, 0.0 }
 0x13d   : > { %v1019_v29 = vpop.f32.mrf.mxu0  ;;  %v1147_v30 = vpop.f32.mrf.mxu1 }
 0x13e   : > { %v2277_v31 = vpack.c.bf16 %v1491_v27, %v1490_v25  ;;  %v2357_v32 = vpack.c.bf16 %v1523_v28, %v1522_v26  ;;  %v1428_v35 = vadd.f32 %v2906_v13, %v1019_v29  ;;  %v1460_v36 = vadd.f32 %v2906_v13, %v1147_v30 }
 0x13f   : > { %v1021_v33 = vpop.f32.mrf.mxu0  ;;  %v1149_v34 = vpop.f32.mrf.mxu1 }
 0x140   : > { %2405 = vst [vmem:[%s2915_s11 + $0x38] sm:$0xff] %v2277_v31   ;;  %2421 = vst [vmem:[%s2915_s11 + $0xb8] sm:$0xff] %v2357_v32   ;;  %v1492_v43 = vmax.f32 %v1428_v35, 0.0  ;;  %v1524_v44 = vmax.f32 %v1460_v36, 0.0 }
 0x141   : > { %v1022_v37 = vpop.f32.mrf.mxu0  ;;  %v1150_v38 = vpop.f32.mrf.mxu1 }
 0x142   : > { %v1429_v39 = vadd.f32 %v2906_v13, %v1022_v37  ;;  %v1461_v40 = vadd.f32 %v2906_v13, %v1150_v38 }
 0x143   : > { %v1024_v41 = vpop.f32.mrf.mxu0  ;;  %v1152_v42 = vpop.f32.mrf.mxu1 }
 0x144   : > { %v1493_v45 = vmax.f32 %v1429_v39, 0.0  ;;  %v1525_v46 = vmax.f32 %v1461_v40, 0.0 }
 0x145   : > { %v1027_v47 = vpop.f32.mrf.mxu0  ;;  %v1155_v48 = vpop.f32.mrf.mxu1 }
 0x146   : > { %v2282_v49 = vpack.c.bf16 %v1493_v45, %v1492_v43  ;;  %v2362_v50 = vpack.c.bf16 %v1525_v46, %v1524_v44  ;;  %v1430_v53 = vadd.f32 %v2906_v13, %v1027_v47  ;;  %v1462_v54 = vadd.f32 %v2906_v13, %v1155_v48 }
 0x147   : > { %v1029_v51 = vpop.f32.mrf.mxu0  ;;  %v1157_v52 = vpop.f32.mrf.mxu1 }
 0x148   : > { %2406 = vst [vmem:[%s2915_s11 + $0x40] sm:$0xff] %v2282_v49   ;;  %2422 = vst [vmem:[%s2915_s11 + $0xc0] sm:$0xff] %v2362_v50   ;;  %v1494_v61 = vmax.f32 %v1430_v53, 0.0  ;;  %v1526_v62 = vmax.f32 %v1462_v54, 0.0 }
 0x149   : > { %v1030_v55 = vpop.f32.mrf.mxu0  ;;  %v1158_v56 = vpop.f32.mrf.mxu1 }
 0x14a   : > { %v1431_v57 = vadd.f32 %v2906_v13, %v1030_v55  ;;  %v1463_v58 = vadd.f32 %v2906_v13, %v1158_v56 }
 0x14b   : > { %v1032_v59 = vpop.f32.mrf.mxu0  ;;  %v1160_v60 = vpop.f32.mrf.mxu1 }
 0x14c   : > { %v1495_v63 = vmax.f32 %v1431_v57, 0.0  ;;  %v1527_v0 = vmax.f32 %v1463_v58, 0.0 }
 0x14d   : > { %v1035_v1 = vpop.f32.mrf.mxu0  ;;  %v1163_v2 = vpop.f32.mrf.mxu1 }
 0x14e   : > { %v2287_v3 = vpack.c.bf16 %v1495_v63, %v1494_v61  ;;  %v2367_v4 = vpack.c.bf16 %v1527_v0, %v1526_v62  ;;  %v1432_v7 = vadd.f32 %v2906_v13, %v1035_v1  ;;  %v1464_v8 = vadd.f32 %v2906_v13, %v1163_v2 }
 0x14f   : > { %v1037_v5 = vpop.f32.mrf.mxu0  ;;  %v1165_v6 = vpop.f32.mrf.mxu1 }
 0x150   : > { %2407 = vst [vmem:[%s2915_s11 + $0x48] sm:$0xff] %v2287_v3   ;;  %2423 = vst [vmem:[%s2915_s11 + $0xc8] sm:$0xff] %v2367_v4   ;;  %v1496_v16 = vmax.f32 %v1432_v7, 0.0  ;;  %v1528_v17 = vmax.f32 %v1464_v8, 0.0 }
 0x151   : > { %v1038_v9 = vpop.f32.mrf.mxu0  ;;  %v1166_v10 = vpop.f32.mrf.mxu1 }
 0x152   : > { %v1433_v11 = vadd.f32 %v2906_v13, %v1038_v9  ;;  %v1465_v12 = vadd.f32 %v2906_v13, %v1166_v10 }
 0x153   : > { %v1040_v14 = vpop.f32.mrf.mxu0  ;;  %v1168_v15 = vpop.f32.mrf.mxu1 }
 0x154   : > { %v1497_v18 = vmax.f32 %v1433_v11, 0.0  ;;  %v1529_v19 = vmax.f32 %v1465_v12, 0.0 }
 0x155   : > { %v1043_v20 = vpop.f32.mrf.mxu0  ;;  %v1171_v21 = vpop.f32.mrf.mxu1 }
 0x156   : > { %v2292_v22 = vpack.c.bf16 %v1497_v18, %v1496_v16  ;;  %v2372_v23 = vpack.c.bf16 %v1529_v19, %v1528_v17  ;;  %v1434_v26 = vadd.f32 %v2906_v13, %v1043_v20  ;;  %v1466_v27 = vadd.f32 %v2906_v13, %v1171_v21 }
 0x157   : > { %v1045_v24 = vpop.f32.mrf.mxu0  ;;  %v1173_v25 = vpop.f32.mrf.mxu1 }
 0x158   : > { %2408 = vst [vmem:[%s2915_s11 + $0x50] sm:$0xff] %v2292_v22   ;;  %2424 = vst [vmem:[%s2915_s11 + $0xd0] sm:$0xff] %v2372_v23   ;;  %v1498_v34 = vmax.f32 %v1434_v26, 0.0  ;;  %v1530_v35 = vmax.f32 %v1466_v27, 0.0 }
 0x159   : > { %v1046_v28 = vpop.f32.mrf.mxu0  ;;  %v1174_v29 = vpop.f32.mrf.mxu1 }
 0x15a   : > { %v1435_v30 = vadd.f32 %v2906_v13, %v1046_v28  ;;  %v1467_v31 = vadd.f32 %v2906_v13, %v1174_v29 }
 0x15b   : > { %v1048_v32 = vpop.f32.mrf.mxu0  ;;  %v1176_v33 = vpop.f32.mrf.mxu1 }
 0x15c   : > { %v1499_v36 = vmax.f32 %v1435_v30, 0.0  ;;  %v1531_v37 = vmax.f32 %v1467_v31, 0.0 }
 0x15d   : > { %v1051_v38 = vpop.f32.mrf.mxu0  ;;  %v1179_v39 = vpop.f32.mrf.mxu1 }
 0x15e   : > { %v2297_v40 = vpack.c.bf16 %v1499_v36, %v1498_v34  ;;  %v2377_v41 = vpack.c.bf16 %v1531_v37, %v1530_v35  ;;  %v1436_v44 = vadd.f32 %v2906_v13, %v1051_v38  ;;  %v1468_v45 = vadd.f32 %v2906_v13, %v1179_v39 }
 0x15f   : > { %v1053_v42 = vpop.f32.mrf.mxu0  ;;  %v1181_v43 = vpop.f32.mrf.mxu1 }
 0x160   : > { %2409 = vst [vmem:[%s2915_s11 + $0x58] sm:$0xff] %v2297_v40   ;;  %2425 = vst [vmem:[%s2915_s11 + $0xd8] sm:$0xff] %v2377_v41   ;;  %v1500_v52 = vmax.f32 %v1436_v44, 0.0  ;;  %v1532_v53 = vmax.f32 %v1468_v45, 0.0 }
 0x161   : > { %v1054_v46 = vpop.f32.mrf.mxu0  ;;  %v1182_v47 = vpop.f32.mrf.mxu1 }
 0x162   : > { %v1437_v48 = vadd.f32 %v2906_v13, %v1054_v46  ;;  %v1469_v49 = vadd.f32 %v2906_v13, %v1182_v47 }
 0x163   : > { %v1056_v50 = vpop.f32.mrf.mxu0  ;;  %v1184_v51 = vpop.f32.mrf.mxu1 }
 0x164   : > { %v1501_v54 = vmax.f32 %v1437_v48, 0.0  ;;  %v1533_v55 = vmax.f32 %v1469_v49, 0.0 }
 0x165   : > { %v1059_v56 = vpop.f32.mrf.mxu0  ;;  %v1187_v57 = vpop.f32.mrf.mxu1 }
 0x166   : > { %v2302_v58 = vpack.c.bf16 %v1501_v54, %v1500_v52  ;;  %v2382_v59 = vpack.c.bf16 %v1533_v55, %v1532_v53  ;;  %v1438_v62 = vadd.f32 %v2906_v13, %v1059_v56  ;;  %v1470_v63 = vadd.f32 %v2906_v13, %v1187_v57 }
 0x167   : > { %v1061_v60 = vpop.f32.mrf.mxu0  ;;  %v1189_v61 = vpop.f32.mrf.mxu1 }
 0x168   : > { %2410 = vst [vmem:[%s2915_s11 + $0x60] sm:$0xff] %v2302_v58   ;;  %2426 = vst [vmem:[%s2915_s11 + $0xe0] sm:$0xff] %v2382_v59   ;;  %v1502_v6 = vmax.f32 %v1438_v62, 0.0  ;;  %v1534_v7 = vmax.f32 %v1470_v63, 0.0 }
 0x169   : > { %v1062_v0 = vpop.f32.mrf.mxu0  ;;  %v1190_v1 = vpop.f32.mrf.mxu1 }
 0x16a   : > { %v1439_v2 = vadd.f32 %v2906_v13, %v1062_v0  ;;  %v1471_v3 = vadd.f32 %v2906_v13, %v1190_v1 }
 0x16b   : > { %v1064_v4 = vpop.f32.mrf.mxu0  ;;  %v1192_v5 = vpop.f32.mrf.mxu1 }
 0x16c   : > { %v1503_v8 = vmax.f32 %v1439_v2, 0.0  ;;  %v1535_v9 = vmax.f32 %v1471_v3, 0.0 }
 0x16d   : > { %v1067_v10 = vpop.f32.mrf.mxu0  ;;  %v1195_v11 = vpop.f32.mrf.mxu1 }
 0x16e   : > { %v2307_v12 = vpack.c.bf16 %v1503_v8, %v1502_v6  ;;  %v2387_v14 = vpack.c.bf16 %v1535_v9, %v1534_v7  ;;  %v1440_v17 = vadd.f32 %v2906_v13, %v1067_v10  ;;  %v1472_v18 = vadd.f32 %v2906_v13, %v1195_v11 }
 0x16f   : > { %v1069_v15 = vpop.f32.mrf.mxu0  ;;  %v1197_v16 = vpop.f32.mrf.mxu1 }
 0x170   : > { %2411 = vst [vmem:[%s2915_s11 + $0x68] sm:$0xff] %v2307_v12   ;;  %2427 = vst [vmem:[%s2915_s11 + $0xe8] sm:$0xff] %v2387_v14   ;;  %v1504_v25 = vmax.f32 %v1440_v17, 0.0  ;;  %v1536_v26 = vmax.f32 %v1472_v18, 0.0 }
 0x171   : > { %v1070_v19 = vpop.f32.mrf.mxu0  ;;  %v1198_v20 = vpop.f32.mrf.mxu1 }
 0x172   : > { %v1441_v21 = vadd.f32 %v2906_v13, %v1070_v19  ;;  %v1473_v22 = vadd.f32 %v2906_v13, %v1198_v20 }
 0x173   : > { %v1072_v23 = vpop.f32.mrf.mxu0  ;;  %v1200_v24 = vpop.f32.mrf.mxu1 }
 0x174   : > { %v1505_v27 = vmax.f32 %v1441_v21, 0.0  ;;  %v1537_v28 = vmax.f32 %v1473_v22, 0.0 }
 0x175   : > { %v1075_v29 = vpop.f32.mrf.mxu0  ;;  %v1203_v30 = vpop.f32.mrf.mxu1 }
 0x176   : > { %v2312_v31 = vpack.c.bf16 %v1505_v27, %v1504_v25  ;;  %v2392_v32 = vpack.c.bf16 %v1537_v28, %v1536_v26  ;;  %v1442_v35 = vadd.f32 %v2906_v13, %v1075_v29  ;;  %v1474_v36 = vadd.f32 %v2906_v13, %v1203_v30 }
 0x177   : > { %v1077_v33 = vpop.f32.mrf.mxu0  ;;  %v1205_v34 = vpop.f32.mrf.mxu1 }
 0x178   : > { %2412 = vst [vmem:[%s2915_s11 + $0x70] sm:$0xff] %v2312_v31   ;;  %2428 = vst [vmem:[%s2915_s11 + $0xf0] sm:$0xff] %v2392_v32   ;;  %v1506_v43 = vmax.f32 %v1442_v35, 0.0  ;;  %v1538_v44 = vmax.f32 %v1474_v36, 0.0 }
 0x179   : > { %v1078_v37 = vpop.f32.mrf.mxu0  ;;  %v1206_v38 = vpop.f32.mrf.mxu1 }
 0x17a   : > { %v1443_v39 = vadd.f32 %v2906_v13, %v1078_v37  ;;  %v1475_v40 = vadd.f32 %v2906_v13, %v1206_v38 }
 0x17b   : > { %v1080_v41 = vpop.f32.mrf.mxu0  ;;  %v1208_v42 = vpop.f32.mrf.mxu1 }
 0x17c   : > { %v1507_v45 = vmax.f32 %v1443_v39, 0.0  ;;  %v1539_v46 = vmax.f32 %v1475_v40, 0.0 }
 0x17e   : > { %v2317_v13 = vpack.c.bf16 %v1507_v45, %v1506_v43  ;;  %v2397_v47 = vpack.c.bf16 %v1539_v46, %v1538_v44 }
 0x180   : > { %2413 = vst [vmem:[%s2915_s11 + $0x78] sm:$0xff] %v2317_v13   ;;  %2429 = vst [vmem:[%s2915_s11 + $0xf8] sm:$0xff] %v2397_v47  }
 0x181   : > { %2627 = shalt.err (!%p2624_p5)
}
 0x182   : > { %s2628_s4 = scalar_lea.hbm %s3012_s26, 4096  ;;  %s2632_s7 = scalar_lea.hbm %s3068_s3, 16384 }
 0x183   : > { %p2629_p6 = scmp.ne.s32.totalorder %s3012_s26, %s2628_s4  ;;  %p2633_p10 = scmp.lt.s32.totalorder %s3012_s26, %s3068_s3 }
 0x184   : > { %p2634_p11 = scmp.lt.s32.totalorder %s2632_s7, %s2628_s4 }
 0x185   : > { %p2630_p7 = pnand %p2629_p6, %p2756_p4 }
 0x186   : > { %p2635_p12 = por %p2634_p11, %p2633_p10 }
 0x187   : > { %p2631_p9 = pneg %p2630_p7 }
 0x189   : > { %p2636_p13 = pnand %p2635_p12, %p2631_p9 }
 0x18b   : > { %2639 = shalt.err (!%p2636_p13)
}
 0x18c   : > { %s2694_s9 = smov 64   ;;  %s2695_s11 = smov 4  }
 0x18d   : > { %2450 = dma.vmem_to_hbm [thread:$0]  (%p2756_p4), %s3014_s19, 4096, %s3012_s26, %s3020_s15, %s2694_s9, %s2694_s9, %s2695_s11  }
 0x18e PF: > { %p2456_p0 = scmp.ge.s32.totalorder %s2690_s17, 2  ;;  %s1890_s18 = sand.u32 1, %s2670_s12  }
 0x18f   : > { %s1891_s21 = scalar_lea.sflag [#allocation4], %s1890_s18 }
 0x190   : > { %p2453_p1 = pnand %p2456_p0, %p2763_p8 }
 0x192   : > { %p2454_p2 = pneg %p2453_p1 }
 0x194   : > { %2665 = dma.done.wait (%p2454_p2), %s1891_s21, 4096  }
 0x195   : > { %2667 = vsyncadd (%p2454_p2), %s1891_s21, 4294963200  ;;  %s16_s17 = sadd.s32 1, %s2690_s17   ;;  %s3071_s12 = smov %s2674_s13 }
 0x196   : > { %p13_p3 = scmp.ge.s32.totalorder %s16_s17, 6   ;;  %s3072_s13 = smov %s2678_s14 }
 0x197   : > { %s3073_s14 = smov %s2769_s25  ;;  %s3074_s15 = smov %s2686_s16 }
 0x198   : > { %s3075_s16 = smov %s3077_s20  ;;  %15 = sbr.rel (!%p13_p3) target bundleno = 4 (0x4), region = 81 }
 0x19d   :  { %1896 = vsyncpa [#allocation4], 1 }
 0x19e   :  { %1898 = vsyncpa [#allocation4 + $0x1], 1 }

</bundles_post_ra>
